<compile_context>
chip_gen: v5e
topology: v5e:2x2
jax: 0.10.0
libtpu: 0.0.40
codegen_flags: <defaults>
</compile_context>

<pallas_src>
import jax
import jax.numpy as jnp
from jax.experimental import pallas as pl
from jax.experimental.pallas import tpu as pltpu

IN_DIM = 28 * 28   # 784
H1 = 128
H2 = 64
H2_PAD = 128       # fc2 output lanes padded 64 -> 128 (lane-dense intermediates)
OUT_DIM = 10
OUT_PAD = 128      # fc3 output lanes padded 10 -> 128 (unmasked 128-wide store)


def _round_up(n, m):
    return ((n + m - 1) // m) * m


def mlp_kernel(x_ref, w1_ref, b1_ref, w2_ref, b2_ref, w3_ref, b3_ref, out_ref):
    # Cast x to bf16 (MXU dtype) in-kernel; wrapper never materializes a bf16 copy.
    x = x_ref[...].astype(jnp.bfloat16)
    # fc1 + relu  (bf16 matmul inputs, f32 accumulate / bias / relu)
    h1 = jnp.dot(x, w1_ref[...], preferred_element_type=jnp.float32)
    h1 = jnp.maximum(h1 + b1_ref[...], 0.0)
    # fc2 + relu  (output padded to 128 lanes; padded lanes stay exactly 0)
    h2 = jnp.dot(h1.astype(jnp.bfloat16), w2_ref[...],
                 preferred_element_type=jnp.float32)
    h2 = jnp.maximum(h2 + b2_ref[...], 0.0)
    # fc3 (no activation); 128-lane padded output -> unmasked vst
    out = jnp.dot(h2.astype(jnp.bfloat16), w3_ref[...],
                  preferred_element_type=jnp.float32)
    out_ref[...] = (out + b3_ref[...]).astype(out_ref.dtype)


def simple_nn_forward(x, params, *, tb=512):
    """x: anything that flattens to (-1, 784) (mirrors PyTorch x.view(-1, 784)).

    x is streamed to the kernel in its native dtype (f32 typically) and cast to
    bf16 inside the kernel. tb=512 keeps the double-buffered per-step working set
    at ~4 MiB (f32 x) — under every generation's scoped-VMEM default — while
    amortizing the ~0.35 us per-grid-step overhead.
    """
    w1, b1, w2p, b2p, w3p, b3p = params

    x2d = x.reshape(-1, IN_DIM)          # no dtype cast here (avoid extra HBM pass)
    B = x2d.shape[0]

    # Batch tile selection:
    #  * never bigger than the (16-rounded) batch -> no wasted DMA for small B,
    #  * >= 2 grid steps for medium batches so both v7x TensorCores get work,
    #  * multiple of 16 (bf16 output sublane packing).
    tb_eff = min(tb, max(16, _round_up(B, 16)))
    if B >= 32 and pl.cdiv(B, tb_eff) < 2:
        tb_eff = max(16, _round_up(pl.cdiv(B, 2), 16))
    grid = (pl.cdiv(B, tb_eff),)          # partial last block handled by Pallas

    # Weights/biases: full-array blocks with constant index_map -> fetched once and
    # kept resident in VMEM across all batch tiles.
    def const(shape):
        return pl.BlockSpec(shape, lambda i: tuple(0 for _ in shape))

    out_padded = pl.pallas_call(
        mlp_kernel,
        out_shape=jax.ShapeDtypeStruct((B, OUT_PAD), jnp.bfloat16),
        grid=grid,
        in_specs=[
            pl.BlockSpec((tb_eff, IN_DIM), lambda i: (i, 0)),  # x: streamed per tile
            const((IN_DIM, H1)),    const((1, H1)),            # fc1
            const((H1, H2_PAD)),    const((1, H2_PAD)),        # fc2 (lane-padded)
            const((H2_PAD, OUT_PAD)), const((1, OUT_PAD)),     # fc3 (lane-padded)
        ],
        out_specs=pl.BlockSpec((tb_eff, OUT_PAD), lambda i: (i, 0)),
        compiler_params=pltpu.CompilerParams(
            # batch axis is independent -> shard across the 2 TensorCores on v7x
            dimension_semantics=("parallel",),
        ),
    )(x2d, w1, b1, w2p, b2p, w3p, b3p)

    # Drop the 118 zero lanes; cast the tiny (B, 10) slice back to f32 (negligible).
    return out_padded[:, :OUT_DIM].astype(jnp.float32)


def init_params(key):
    """Deterministic init mirroring nn.Linear's U(-1/sqrt(fan_in), 1/sqrt(fan_in)).

    Weights stored as (in, out) in bfloat16 (MXU-native); biases stay float32.
    fc2 is zero-padded 64 -> 128 output lanes and fc3 to (128, 128) so every
    intermediate and the output store are lane-dense. Zero padding keeps the math
    identical to the unpadded model (padded h2 lanes are exactly 0).
    """
    def linear(key, fan_in, fan_out):
        kw, kb = jax.random.split(key)
        bound = 1.0 / jnp.sqrt(jnp.float32(fan_in))
        w = jax.random.uniform(kw, (fan_in, fan_out), jnp.float32, -bound, bound)
        b = jax.random.uniform(kb, (1, fan_out), jnp.float32, -bound, bound)
        return w, b

    k1, k2, k3 = jax.random.split(key, 3)
    w1, b1 = linear(k1, IN_DIM, H1)
    w2, b2 = linear(k2, H1, H2)
    w3, b3 = linear(k3, H2, OUT_DIM)

    w2p = jnp.zeros((H1, H2_PAD), jnp.float32).at[:, :H2].set(w2)
    b2p = jnp.zeros((1, H2_PAD), jnp.float32).at[:, :H2].set(b2)
    w3p = jnp.zeros((H2_PAD, OUT_PAD), jnp.float32).at[:H2, :OUT_DIM].set(w3)
    b3p = jnp.zeros((1, OUT_PAD), jnp.float32).at[:, :OUT_DIM].set(b3)

    return (w1.astype(jnp.bfloat16), b1,
            w2p.astype(jnp.bfloat16), b2p,
            w3p.astype(jnp.bfloat16), b3p)


def reference_forward(x, params):
    """Pure-JAX reference using the same bf16 weights / f32 accumulation."""
    w1, b1, w2p, b2p, w3p, b3p = params
    x2d = x.reshape(-1, IN_DIM).astype(jnp.bfloat16)
    h1 = jax.nn.relu(jnp.dot(x2d, w1, preferred_element_type=jnp.float32) + b1)
    h2 = jax.nn.relu(
        jnp.dot(h1.astype(jnp.bfloat16), w2p, preferred_element_type=jnp.float32) + b2p)
    out = jnp.dot(h2.astype(jnp.bfloat16), w3p,
                  preferred_element_type=jnp.float32) + b3p
    return out[:, :OUT_DIM]


if __name__ == "__main__":
    key = jax.random.PRNGKey(0)
    kx, kp = jax.random.split(key)

    # MNIST-like input: batch of 8 images, 1x28x28 each (flattened inside forward).
    x = jax.random.normal(kx, (8, 1, 28, 28), jnp.float32)
    params = init_params(kp)

    out = simple_nn_forward(x, params)
    out = jax.block_until_ready(out)

    ref = reference_forward(x, params)
    assert out.shape == (8, OUT_DIM), out.shape
    # Weights/matmuls are bf16 (f32 accumulate) and the kernel output round-trips
    # through bf16, so compare with a loose tolerance.
    assert jnp.allclose(out, ref, atol=3e-2, rtol=3e-2), "mismatch vs reference"

    print("KERNEL_OK")
</pallas_src>

<mosaic_0001>
module attributes {stable_mosaic.version = 11 : i64} {
  func.func @mlp_kernel(%arg0: i32, %arg1: memref<16x784xf32, #tpu.memory_space<vmem>>, %arg2: memref<784x128xbf16, #tpu.memory_space<vmem>>, %arg3: memref<1x128xf32, #tpu.memory_space<vmem>>, %arg4: memref<128x128xbf16, #tpu.memory_space<vmem>>, %arg5: memref<1x128xf32, #tpu.memory_space<vmem>>, %arg6: memref<128x128xbf16, #tpu.memory_space<vmem>>, %arg7: memref<1x128xf32, #tpu.memory_space<vmem>>, %arg8: memref<16x128xbf16, #tpu.memory_space<vmem>>) attributes {dimension_semantics = [#tpu.dimension_semantics<parallel>], iteration_bounds = array<i64: 1>, scalar_prefetch = 0 : i64, scratch_operands = 0 : i64, tpu.core_type = #tpu.core_type<tc>, window_params = [{transform_indices = @transform_0, window_bounds = array<i64: 16, 784>}, {pipeline_mode = #tpu.pipeline_mode<synchronous>, transform_indices = @transform_1, window_bounds = array<i64: 784, 128>}, {pipeline_mode = #tpu.pipeline_mode<synchronous>, transform_indices = @transform_2, window_bounds = array<i64: 1, 128>}, {pipeline_mode = #tpu.pipeline_mode<synchronous>, transform_indices = @transform_3, window_bounds = array<i64: 128, 128>}, {pipeline_mode = #tpu.pipeline_mode<synchronous>, transform_indices = @transform_4, window_bounds = array<i64: 1, 128>}, {pipeline_mode = #tpu.pipeline_mode<synchronous>, transform_indices = @transform_5, window_bounds = array<i64: 128, 128>}, {pipeline_mode = #tpu.pipeline_mode<synchronous>, transform_indices = @transform_6, window_bounds = array<i64: 1, 128>}, {transform_indices = @transform_7, window_bounds = array<i64: 16, 128>}]} {
    %c0 = arith.constant 0 : index
    %c0_0 = arith.constant 0 : index
    %0 = vector.load %arg1[%c0, %c0_0] : memref<16x784xf32, #tpu.memory_space<vmem>>, vector<16x784xf32>
    %1 = arith.truncf %0 : vector<16x784xf32> to vector<16x784xbf16>
    %c0_1 = arith.constant 0 : index
    %c0_2 = arith.constant 0 : index
    %2 = vector.load %arg2[%c0_1, %c0_2] : memref<784x128xbf16, #tpu.memory_space<vmem>>, vector<784x128xbf16>
    %cst = arith.constant dense<0.000000e+00> : vector<16x128xf32>
    %3 = tpu.matmul %1, %2, %cst {dimension_numbers = #tpu.dot_dimension_numbers<[1], [0], [0], [1], [0, 0, 1, 1], [], []>} : vector<16x784xbf16>, vector<784x128xbf16>, vector<16x128xf32> -> vector<16x128xf32>
    %c0_3 = arith.constant 0 : index
    %c0_4 = arith.constant 0 : index
    %4 = vector.load %arg3[%c0_3, %c0_4] : memref<1x128xf32, #tpu.memory_space<vmem>>, vector<1x128xf32>
    %5 = vector.broadcast %4 : vector<1x128xf32> to vector<16x128xf32>
    %6 = arith.addf %3, %5 : vector<16x128xf32>
    %cst_5 = arith.constant 0.000000e+00 : f32
    %7 = vector.broadcast %cst_5 : f32 to vector<16x128xf32>
    %8 = arith.maximumf %6, %7 : vector<16x128xf32>
    %9 = arith.truncf %8 : vector<16x128xf32> to vector<16x128xbf16>
    %c0_6 = arith.constant 0 : index
    %c0_7 = arith.constant 0 : index
    %10 = vector.load %arg4[%c0_6, %c0_7] : memref<128x128xbf16, #tpu.memory_space<vmem>>, vector<128x128xbf16>
    %cst_8 = arith.constant dense<0.000000e+00> : vector<16x128xf32>
    %11 = tpu.matmul %9, %10, %cst_8 {dimension_numbers = #tpu.dot_dimension_numbers<[1], [0], [0], [1], [0, 0, 1, 1], [], []>} : vector<16x128xbf16>, vector<128x128xbf16>, vector<16x128xf32> -> vector<16x128xf32>
    %c0_9 = arith.constant 0 : index
    %c0_10 = arith.constant 0 : index
    %12 = vector.load %arg5[%c0_9, %c0_10] : memref<1x128xf32, #tpu.memory_space<vmem>>, vector<1x128xf32>
    %13 = vector.broadcast %12 : vector<1x128xf32> to vector<16x128xf32>
    %14 = arith.addf %11, %13 : vector<16x128xf32>
    %cst_11 = arith.constant 0.000000e+00 : f32
    %15 = vector.broadcast %cst_11 : f32 to vector<16x128xf32>
    %16 = arith.maximumf %14, %15 : vector<16x128xf32>
    %17 = arith.truncf %16 : vector<16x128xf32> to vector<16x128xbf16>
    %c0_12 = arith.constant 0 : index
    %c0_13 = arith.constant 0 : index
    %18 = vector.load %arg6[%c0_12, %c0_13] : memref<128x128xbf16, #tpu.memory_space<vmem>>, vector<128x128xbf16>
    %cst_14 = arith.constant dense<0.000000e+00> : vector<16x128xf32>
    %19 = tpu.matmul %17, %18, %cst_14 {dimension_numbers = #tpu.dot_dimension_numbers<[1], [0], [0], [1], [0, 0, 1, 1], [], []>} : vector<16x128xbf16>, vector<128x128xbf16>, vector<16x128xf32> -> vector<16x128xf32>
    %c0_15 = arith.constant 0 : index
    %c0_16 = arith.constant 0 : index
    %20 = vector.load %arg7[%c0_15, %c0_16] : memref<1x128xf32, #tpu.memory_space<vmem>>, vector<1x128xf32>
    %21 = vector.broadcast %20 : vector<1x128xf32> to vector<16x128xf32>
    %22 = arith.addf %19, %21 : vector<16x128xf32>
    %23 = arith.truncf %22 : vector<16x128xf32> to vector<16x128xbf16>
    %c0_17 = arith.constant 0 : index
    %c0_18 = arith.constant 0 : index
    %24 = vector.load %arg8[%c0_17, %c0_18] : memref<16x128xbf16, #tpu.memory_space<vmem>>, vector<16x128xbf16>
    tpu.vector_store %arg8[%c0_17, %c0_18], %23 {strides = array<i32>} : memref<16x128xbf16, #tpu.memory_space<vmem>>, vector<16x128xbf16>,
    return
  }
  func.func @transform_0(%arg0: i32) -> (i32, i32) {
    %c0_i32 = arith.constant 0 : i32
    %c0_i32_0 = arith.constant 0 : i32
    return %arg0, %c0_i32 : i32, i32
  }
  func.func @transform_1(%arg0: i32) -> (i32, i32) {
    %c0_i32 = arith.constant 0 : i32
    %c0_i32_0 = arith.constant 0 : i32
    %c0_i32_1 = arith.constant 0 : i32
    return %c0_i32, %c0_i32_0 : i32, i32
  }
  func.func @transform_2(%arg0: i32) -> (i32, i32) {
    %c0_i32 = arith.constant 0 : i32
    %c0_i32_0 = arith.constant 0 : i32
    %c0_i32_1 = arith.constant 0 : i32
    return %c0_i32, %c0_i32_0 : i32, i32
  }
  func.func @transform_3(%arg0: i32) -> (i32, i32) {
    %c0_i32 = arith.constant 0 : i32
    %c0_i32_0 = arith.constant 0 : i32
    %c0_i32_1 = arith.constant 0 : i32
    return %c0_i32, %c0_i32_0 : i32, i32
  }
  func.func @transform_4(%arg0: i32) -> (i32, i32) {
    %c0_i32 = arith.constant 0 : i32
    %c0_i32_0 = arith.constant 0 : i32
    %c0_i32_1 = arith.constant 0 : i32
    return %c0_i32, %c0_i32_0 : i32, i32
  }
  func.func @transform_5(%arg0: i32) -> (i32, i32) {
    %c0_i32 = arith.constant 0 : i32
    %c0_i32_0 = arith.constant 0 : i32
    %c0_i32_1 = arith.constant 0 : i32
    return %c0_i32, %c0_i32_0 : i32, i32
  }
  func.func @transform_6(%arg0: i32) -> (i32, i32) {
    %c0_i32 = arith.constant 0 : i32
    %c0_i32_0 = arith.constant 0 : i32
    %c0_i32_1 = arith.constant 0 : i32
    return %c0_i32, %c0_i32_0 : i32, i32
  }
  func.func @transform_7(%arg0: i32) -> (i32, i32) {
    %c0_i32 = arith.constant 0 : i32
    %c0_i32_0 = arith.constant 0 : i32
    return %arg0, %c0_i32 : i32, i32
  }
}

</mosaic_0001>

<bundles_post_ra>
// kernel: tpu_custom_call.1
= control target key start
LH: loop header
LB: loop body
LE: loop exit
PB: predicated region body
PF: predicated region fallthrough
CT: control target
= control target key end

     0   :  { %12 = vsyncpa [#allocation3], 0  ;;  %s1361_s0 = inlined_call_operand.hbm [shape: f32[8,784], index: 0, kind: input, shape index: {}]   ;;  %s1362_s1 = inlined_call_operand.hbm [shape: bf16[784,128], index: 1, kind: input, shape index: {}]   ;;  %s1363_s2 = inlined_call_operand.vmem [shape: f32[1,128], index: 2, kind: input, shape index: {}]   ;;  %s1364_s3 = inlined_call_operand.hbm [shape: bf16[128,128], index: 3, kind: input, shape index: {}]   ;;  %s1365_s4 = inlined_call_operand.vmem [shape: f32[1,128], index: 4, kind: input, shape index: {}]   ;;  %s1366_s5 = inlined_call_operand.hbm [shape: bf16[128,128], index: 5, kind: input, shape index: {}]   ;;  %s1367_s6 = inlined_call_operand.vmem [shape: f32[1,128], index: 6, kind: input, shape index: {}]   ;;  %s1368_s7 = inlined_call_operand.hbm [shape: bf16[8,128], index: 7, kind: output, shape index: {}]  }
   0x1   :  { %13 = vsyncpa [#allocation6], 0 }
   0x2   :  { %14 = vsyncpa [#allocation9], 0 }
   0x3   :  { %15 = vsyncpa [#allocation4], 0  ;;  %s33_s26 = sshll.u32 %s1362_s1, 4  ;;  %s34_s26 = int_to_ptr.hbm [resolvable:$true] %s33_s26 }
   0x4   :  { %19 = vsyncadd [#allocation3], 896  ;;  %s1276_s27 = smov [#allocation5]   ;;  %s20_s8 = sshll.u32 %s1361_s0, 4  ;;  %s21_s8 = int_to_ptr.hbm [resolvable:$true] %s20_s8 }
   0x5   :  { %s35_s28 = sshll.u32 %s1276_s27, 4  ;;  %s1277_s9 = smov 64   ;;  %s36_s28 = int_to_ptr.vmem [resolvable:$true] %s35_s28 }
   0x6   :  { %s1278_s10 = smov 4   ;;  %s1279_s11 = smov [#allocation2]  }
   0x7   :  { %41 = dma.hbm_to_vmem [thread:$0]  %s34_s26, 6272, %s36_s28, [#allocation6], %s1277_s9, %s1277_s9, %s1278_s10  }
   0x8   :  { %s22_s12 = sshll.u32 %s1279_s11, 4  ;;  %s1280_s1 = smov 896   ;;  %s23_s12 = int_to_ptr.vmem [resolvable:$true] %s22_s12 }
   0x9   :  { %s1281_s13 = smov 56   ;;  %s48_s16 = sshll.u32 %s1364_s3, 4  ;;  %s49_s16 = int_to_ptr.hbm [resolvable:$true] %s48_s16 }
   0xa   :  { %28 = dma.hbm_to_vmem [thread:$0]  %s21_s8, 896, %s23_s12, [#allocation3], %s1280_s1, %s1280_s1, %s1281_s13  }
   0xb   :  { %s1282_s17 = smov [#allocation7]   ;;  %s63_s20 = sshll.u32 %s1366_s5, 4  ;;  %s64_s20 = int_to_ptr.hbm [resolvable:$true] %s63_s20 }
   0xc   :  { %s50_s0 = sshll.u32 %s1282_s17, 4  ;;  %s1283_s21 = smov [#allocation8]   ;;  %s51_s0 = int_to_ptr.vmem [resolvable:$true] %s50_s0 }
   0xd   :  { %56 = dma.hbm_to_vmem [thread:$0]  %s49_s16, 1024, %s51_s0, [#allocation6], %s1277_s9, %s1277_s9, %s1278_s10  }
   0xe   :  { %s65_s22 = sshll.u32 %s1283_s21, 4  ;;  %s66_s22 = int_to_ptr.vmem [resolvable:$true] %s65_s22 }
   0xf   :  { %71 = dma.hbm_to_vmem [thread:$0]  %s64_s20, 1024, %s66_s22, [#allocation9], %s1277_s9, %s1277_s9, %s1278_s10  }
  0x10   :  { %1268 = dma.done.wait [#allocation3], 1792  }
  0x11   :  { %1269 = vsyncadd [#allocation3], 4294965504 }
  0x12   :  { %1270 = dma.done.wait [#allocation6], 7296  }
  0x13   :  { %1271 = vsyncadd [#allocation6], 4294960000 }
  0x14   :  { %1272 = dma.done.wait [#allocation9], 1024  }
  0x15   :  { %1273 = vsyncadd [#allocation9], 4294966272  ;;  %v1073_v0 = vld [vmem:[#allocation5 + $0x38] sm:$0xff]  ;;  %v1072_v4 = vld [vmem:[#allocation5 + $0x30] sm:$0xff]  ;;  %vm508_vm0 = vcmask 130048  }
  0x16   :  { %v1081_v1 = vld [vmem:[#allocation5 + $0x78] sm:$0xff]  ;;  %512 = vmatpush.bf16.msra.mxu0 %v1073_v0  ;;  %v1080_v5 = vld [vmem:[#allocation5 + $0x70] sm:$0xff]  ;;  %v1071_v8 = vld [vmem:[#allocation5 + $0x28] sm:$0xff] }
  0x17   :  { %v1089_v2 = vld [vmem:[#allocation5 + $0xb8] sm:$0xff]  ;;  %526 = vmatpush.bf16.msra.mxu1 %v1081_v1  ;;  %v1088_v6 = vld [vmem:[#allocation5 + $0xb0] sm:$0xff]  ;;  %v1079_v9 = vld [vmem:[#allocation5 + $0x68] sm:$0xff] }
  0x18   :  { %v1097_v3 = vld [vmem:[#allocation5 + $0xf8] sm:$0xff]  ;;  %540 = vmatpush.bf16.msra.mxu2 %v1089_v2  ;;  %v1096_v7 = vld [vmem:[#allocation5 + $0xf0] sm:$0xff]  ;;  %v1087_v10 = vld [vmem:[#allocation5 + $0xa8] sm:$0xff] }
  0x19   :  { %554 = vmatpush.bf16.msra.mxu3 %v1097_v3  ;;  %v1095_v11 = vld [vmem:[#allocation5 + $0xe8] sm:$0xff]  ;;  %v1070_v12 = vld [vmem:[#allocation5 + $0x20] sm:$0xff]  ;;  %v1069_v16 = vld [vmem:[#allocation5 + $0x18] sm:$0xff] }
  0x1a   :  { %513 = vmatpush.bf16.msra.mxu0 %v1072_v4  ;;  %v1078_v13 = vld [vmem:[#allocation5 + $0x60] sm:$0xff]  ;;  %v1077_v17 = vld [vmem:[#allocation5 + $0x58] sm:$0xff]  ;;  %v1068_v20 = vld [vmem:[#allocation5 + $0x10] sm:$0xff] }
  0x1b   :  { %527 = vmatpush.bf16.msra.mxu1 %v1080_v5  ;;  %v1086_v14 = vld [vmem:[#allocation5 + $0xa0] sm:$0xff]  ;;  %v1085_v18 = vld [vmem:[#allocation5 + $0x98] sm:$0xff]  ;;  %v1076_v21 = vld [vmem:[#allocation5 + $0x50] sm:$0xff] }
  0x1c   :  { %541 = vmatpush.bf16.msra.mxu2 %v1088_v6  ;;  %v1094_v15 = vld [vmem:[#allocation5 + $0xe0] sm:$0xff]  ;;  %v1093_v19 = vld [vmem:[#allocation5 + $0xd8] sm:$0xff]  ;;  %v1084_v22 = vld [vmem:[#allocation5 + $0x90] sm:$0xff] }
  0x1d   :  { %555 = vmatpush.bf16.msra.mxu3 %v1096_v7  ;;  %v1092_v23 = vld [vmem:[#allocation5 + $0xd0] sm:$0xff]  ;;  %v1067_v24 = vld [vmem:[#allocation5 + $0x8] sm:$0xff]  ;;  %v1066_v28 = vld [vmem:[#allocation5] sm:$0xff] }
  0x1e   :  { %514 = vmatpush.bf16.msra.mxu0 %v1071_v8  ;;  %v1075_v25 = vld [vmem:[#allocation5 + $0x48] sm:$0xff]  ;;  %v1074_v29 = vld [vmem:[#allocation5 + $0x40] sm:$0xff]  ;;  %v91_v30 = vld [vmem:[#allocation2] sm:$0xff] }
  0x1f   :  { %528 = vmatpush.bf16.msra.mxu1 %v1079_v9  ;;  %v1083_v26 = vld [vmem:[#allocation5 + $0x88] sm:$0xff]  ;;  %v92_v32 = vld [vmem:[#allocation2 + $0x8] sm:$0xff]  ;;  %v99_v33 = vld [vmem:[#allocation2 + $0x40] sm:$0xff] }
  0x20   :  { %542 = vmatpush.bf16.msra.mxu2 %v1087_v10  ;;  %v1091_v27 = vld [vmem:[#allocation5 + $0xc8] sm:$0xff]  ;;  %v1105_v34 = vld [vmem:[#allocation5 + $0x138] sm:$0xff]  ;;  %v1082_v36 = vld [vmem:[#allocation5 + $0x80] sm:$0xff]  ;;  %v106_v43 = vpack.c.bf16 %v99_v33, %v92_v32 }
  0x21   :  { %556 = vmatpush.bf16.msra.mxu3 %v1095_v11  ;;  %v98_v31 = vld [vmem:[#allocation2 + $0x38] sm:$0xff]  ;;  %v1113_v35 = vld [vmem:[#allocation5 + $0x178] sm:$0xff]  ;;  %v1090_v37 = vld [vmem:[#allocation5 + $0xc0] sm:$0xff] }
  0x22   :  { %515 = vmatpush.bf16.msra.mxu0 %v1070_v12  ;;  %v93_v38 = vld [vmem:[#allocation2 + $0x10] sm:$0xff]  ;;  %v100_v39 = vld [vmem:[#allocation2 + $0x48] sm:$0xff]  ;;  %v105_v40 = vpack.c.bf16 %v98_v31, %v91_v30  ;;  %v94_v41 = vld [vmem:[#allocation2 + $0x18] sm:$0xff] }
  0x23   :  { %529 = vmatpush.bf16.msra.mxu1 %v1078_v13  ;;  %v101_v42 = vld [vmem:[#allocation2 + $0x50] sm:$0xff]  ;;  %v1104_v45 = vld [vmem:[#allocation5 + $0x130] sm:$0xff]  ;;  %v107_v47 = vpack.c.bf16 %v100_v39, %v93_v38  ;;  %v1103_v49 = vld [vmem:[#allocation5 + $0x128] sm:$0xff] }
  0x24   :  { %543 = vmatpush.bf16.msra.mxu2 %v1086_v14  ;;  %v1114_v44 = vld [vmem:[#allocation5 + $0x180] sm:$0xff]  ;;  %v1112_v46 = vld [vmem:[#allocation5 + $0x170] sm:$0xff]  ;;  %v108_v48 = vpack.c.bf16 %v101_v42, %v94_v41  ;;  %v1111_v50 = vld [vmem:[#allocation5 + $0x168] sm:$0xff] }
  0x25   :  { %557 = vmatpush.bf16.msra.mxu3 %v1094_v15  ;;  %v1102_v51 = vld [vmem:[#allocation5 + $0x120] sm:$0xff]  ;;  %v1101_v53 = vld [vmem:[#allocation5 + $0x118] sm:$0xff]  ;;  %v1100_v57 = vld [vmem:[#allocation5 + $0x110] sm:$0xff] }
  0x26   :  { %516 = vmatpush.bf16.msra.mxu0 %v1069_v16  ;;  %v1110_v52 = vld [vmem:[#allocation5 + $0x160] sm:$0xff]  ;;  %v1109_v54 = vld [vmem:[#allocation5 + $0x158] sm:$0xff]  ;;  %v1108_v58 = vld [vmem:[#allocation5 + $0x150] sm:$0xff] }
  0x27   :  { %530 = vmatpush.bf16.msra.mxu1 %v1077_v17  ;;  %v97_v55 = vld [vmem:[#allocation2 + $0x30] sm:$0xff]  ;;  %v104_v56 = vld [vmem:[#allocation2 + $0x68] sm:$0xff]  ;;  %v1099_v60 = vld [vmem:[#allocation5 + $0x108] sm:$0xff] }
  0x28   :  { %544 = vmatpush.bf16.msra.mxu2 %v1085_v18  ;;  %v111_v59 = vpack.c.bf16 %v104_v56, %v97_v55  ;;  %v1107_v61 = vld [vmem:[#allocation5 + $0x148] sm:$0xff]  ;;  %v1098_v62 = vld [vmem:[#allocation5 + $0x100] sm:$0xff]  ;;  %v95_v0 = vld [vmem:[#allocation2 + $0x20] sm:$0xff] }
  0x29   :  { %558 = vmatpush.bf16.msra.mxu3 %v1093_v19  ;;  %v1106_v63 = vld [vmem:[#allocation5 + $0x140] sm:$0xff]  ;;  %v102_v1 = vld [vmem:[#allocation2 + $0x58] sm:$0xff]  ;;  %v96_v2 = vld [vmem:[#allocation2 + $0x28] sm:$0xff] }
  0x2a   :  { %517 = vmatpush.bf16.msra.mxu0 %v1068_v20  ;;  %v103_v3 = vld [vmem:[#allocation2 + $0x60] sm:$0xff]  ;;  %v109_v4 = vpack.c.bf16 %v102_v1, %v95_v0  ;;  %v1122_v6 = vld [vmem:[#allocation7 + $0x38] sm:$0xff]  ;;  %v1121_v7 = vld [vmem:[#allocation7 + $0x30] sm:$0xff] }
  0x2b   :  { %531 = vmatpush.bf16.msra.mxu1 %v1076_v21  ;;  %v110_v5 = vpack.c.bf16 %v103_v3, %v96_v2  ;;  %v1120_v8 = vld [vmem:[#allocation7 + $0x28] sm:$0xff]  ;;  %v1119_v9 = vld [vmem:[#allocation7 + $0x20] sm:$0xff]  ;;  %v1118_v10 = vld [vmem:[#allocation7 + $0x18] sm:$0xff] }
  0x2c   :  { %545 = vmatpush.bf16.msra.mxu2 %v1084_v22  ;;  %v1117_v11 = vld [vmem:[#allocation7 + $0x10] sm:$0xff]  ;;  %v1116_v12 = vld [vmem:[#allocation7 + $0x8] sm:$0xff]  ;;  %v1115_v16 = vld [vmem:[#allocation7] sm:$0xff] }
  0x2d   :  { %559 = vmatpush.bf16.msra.mxu3 %v1092_v23  ;;  %v1145_v17 = vld [vmem:[%s1363_s2] ss:$0 sm:$0xff]  ;;  %v1130_v18 = vld [vmem:[#allocation8 + $0x38] sm:$0xff]  ;;  %v1129_v20 = vld [vmem:[#allocation8 + $0x30] sm:$0xff] }
  0x2e   :  { %518 = vmatpush.bf16.msra.mxu0 %v1067_v24  ;;  %v1146_v55 = vld [vmem:[%s1365_s4] ss:$0 sm:$0xff] }
  0x2f   :  { %532 = vmatpush.bf16.msra.mxu1 %v1075_v25  ;;  %v1128_v25 = vld [vmem:[#allocation8 + $0x28] sm:$0xff] }
  0x30   :  { %546 = vmatpush.bf16.msra.mxu2 %v1083_v26 }
  0x31   :  { %560 = vmatpush.bf16.msra.mxu3 %v1091_v27 }
  0x32   :  { %519 = vmatpush.bf16.msra.mxu0 %v1066_v28 }
  0x33   :  { %533 = vmatpush.bf16.msra.mxu1 %v1074_v29  ;;  %v1127_v29 = vld [vmem:[#allocation8 + $0x20] sm:$0xff] }
  0x34   :  { %547 = vmatpush.bf16.msra.mxu2 %v1082_v36 }
  0x35   :  { %561 = vmatpush.bf16.msra.mxu3 %v1090_v37  ;;  %520 = vmatmul.bf16.vlgmr.msra.gmra.mxu0 %v105_v40 }
  0x36   :  { %568 = vmatpush.bf16.msrb.mxu0 %v1105_v34  ;;  %534 = vmatmul.bf16.vlgmr.msra.gmra.mxu1 %v106_v43 }
  0x37   :  { %582 = vmatpush.bf16.msrb.mxu1 %v1113_v35  ;;  %548 = vmatmul.bf16.vlgmr.msra.gmra.mxu2 %v107_v47 }
  0x38   :  { %603 = vmatpush.bf16.msrb.mxu2 %v1114_v44  ;;  %562 = vmatmul.bf16.vlgmr.msra.gmra.mxu3 %v108_v48 }
  0x39   :  { %681 = vmatpush.bf16.msrb.mxu3 %v1122_v6 }
  0x3a   :  { %569 = vmatpush.bf16.msrb.mxu0 %v1104_v45 }
  0x3b   :  { %583 = vmatpush.bf16.msrb.mxu1 %v1112_v46 }
  0x3c   :  { %766 = vmatpush.bf16.msra.mxu2 %v1130_v18 }
  0x3d   :  { %682 = vmatpush.bf16.msrb.mxu3 %v1121_v7 }
  0x3e   :  { %570 = vmatpush.bf16.msrb.mxu0 %v1103_v49 }
  0x3f   :  { %584 = vmatpush.bf16.msrb.mxu1 %v1111_v50  ;;  %v1126_v50 = vld [vmem:[#allocation8 + $0x18] sm:$0xff] }
  0x40   :  { %767 = vmatpush.bf16.msra.mxu2 %v1129_v20 }
  0x41   :  { %683 = vmatpush.bf16.msrb.mxu3 %v1120_v8 }
  0x42   :  { %571 = vmatpush.bf16.msrb.mxu0 %v1102_v51  ;;  %v1125_v51 = vld [vmem:[#allocation8 + $0x10] sm:$0xff] }
  0x43   :  { %585 = vmatpush.bf16.msrb.mxu1 %v1110_v52  ;;  %v1124_v52 = vld [vmem:[#allocation8 + $0x8] sm:$0xff] }
  0x44   :  { %768 = vmatpush.bf16.msra.mxu2 %v1128_v25 }
  0x45   :  { %684 = vmatpush.bf16.msrb.mxu3 %v1119_v9 }
  0x46   :  { %572 = vmatpush.bf16.msrb.mxu0 %v1101_v53  ;;  %v1123_v53 = vld [vmem:[#allocation8] sm:$0xff] }
  0x47   :  { %586 = vmatpush.bf16.msrb.mxu1 %v1109_v54  ;;  %1001 = vmatmul.msk.bf16.vlgmr.msrb.gmra.mxu2 %vm508_vm0, %v111_v59 }
  0x48   :  { %769 = vmatpush.bf16.msra.mxu2 %v1127_v29 }
  0x49   :  { %685 = vmatpush.bf16.msrb.mxu3 %v1118_v10 }
  0x4a   :  { %573 = vmatpush.bf16.msrb.mxu0 %v1100_v57 }
  0x4b   :  { %587 = vmatpush.bf16.msrb.mxu1 %v1108_v58 }
  0x4c   :  { %770 = vmatpush.bf16.msra.mxu2 %v1126_v50 }
  0x4d   :  { %686 = vmatpush.bf16.msrb.mxu3 %v1117_v11 }
  0x4e   :  { %574 = vmatpush.bf16.msrb.mxu0 %v1099_v60 }
  0x4f   :  { %588 = vmatpush.bf16.msrb.mxu1 %v1107_v61 }
  0x50   :  { %771 = vmatpush.bf16.msra.mxu2 %v1125_v51 }
  0x51   :  { %687 = vmatpush.bf16.msrb.mxu3 %v1116_v12 }
  0x52   :  { %575 = vmatpush.bf16.msrb.mxu0 %v1098_v62 }
  0x53   :  { %589 = vmatpush.bf16.msrb.mxu1 %v1106_v63  ;;  %v1147_v63 = vld [vmem:[%s1367_s6] ss:$0 sm:$0xff] }
  0x54   :  { %772 = vmatpush.bf16.msra.mxu2 %v1124_v52 }
  0x55   :  { %576 = vmatmul.bf16.vlgmr.msrb.gmra.mxu0 %v109_v4  ;;  %688 = vmatpush.bf16.msrb.mxu3 %v1115_v16 }
  0x56   :  { %590 = vmatmul.bf16.vlgmr.msrb.gmra.mxu1 %v110_v5 }
  0x58   :  { %773 = vmatpush.bf16.msra.mxu2 %v1123_v53 }
  0xb2   :  { %v521_v13 = vpop.f32.mrf.mxu0 }
  0xb3   :  { %v535_v14 = vpop.f32.mrf.mxu1  ;;  %v522_v19 = vadd.f32 %v1145_v17, %v521_v13 }
  0xb5   :  { %v536_v24 = vadd.f32 %v535_v14, %v522_v19 }
  0xba   :  { %v549_v15 = vpop.f32.mrf.mxu2  ;;  %v523_v21 = vpop.f32.mrf.mxu0 }
  0xbb   :  { %v537_v22 = vpop.f32.mrf.mxu1  ;;  %v563_v26 = vpop.f32.mrf.mxu3  ;;  %v524_v27 = vadd.f32 %v1145_v17, %v523_v21  ;;  %v550_v28 = vadd.f32 %v549_v15, %v536_v24 }
  0xbd   :  { %v538_v30 = vadd.f32 %v537_v22, %v524_v27  ;;  %v564_v33 = vadd.f32 %v563_v26, %v550_v28 }
  0xc2   :  { %v551_v23 = vpop.f32.mrf.mxu2 }
  0xc3   :  { %v552_v35 = vadd.f32 %v551_v23, %v538_v30  ;;  %v565_v37 = vpop.f32.mrf.mxu3 }
  0xc5   :  { %v566_v38 = vadd.f32 %v565_v37, %v552_v35 }
  0xca   :  { %v605_v34 = vpop.f32.mrf.mxu2 }
  0xd2   :  { %v577_v31 = vpop.f32.mrf.mxu0  ;;  %v607_v45 = vpop.f32.mrf.mxu2 }
  0xd3   :  { %v591_v32 = vpop.f32.mrf.mxu1  ;;  %v578_v36 = vadd.f32 %v577_v31, %v564_v33 }
  0xd5   :  { %v592_v39 = vadd.f32 %v591_v32, %v578_v36 }
  0xd7   :  { %v606_v43 = vadd.f32 %v605_v34, %v592_v39 }
  0xd9   :  { %v610_v47 = vmax.f32 %v606_v43, 0.0 }
  0xda   :  { %v579_v40 = vpop.f32.mrf.mxu0 }
  0xdb   :  { %v580_v41 = vadd.f32 %v579_v40, %v566_v38  ;;  %v593_v42 = vpop.f32.mrf.mxu1 }
  0xdd   :  { %v594_v44 = vadd.f32 %v593_v42, %v580_v41 }
  0xdf   :  { %v608_v46 = vadd.f32 %v607_v45, %v594_v44 }
  0xe1   :  { %v611_v48 = vmax.f32 %v608_v46, 0.0 }
  0xe3   :  { %v612_v49 = vpack.c.bf16 %v611_v48, %v610_v47 }
  0xe5   :  { %689 = vmatmul.bf16.vlgmr.msrb.gmra.mxu3 %v612_v49 }
 0x168   :  { %v690_v54 = vpop.f32.mrf.mxu3 }
 0x169   :  { %v691_v56 = vadd.f32 %v1146_v55, %v690_v54 }
 0x16b   :  { %v695_v59 = vmax.f32 %v691_v56, 0.0 }
 0x170   :  { %v692_v57 = vpop.f32.mrf.mxu3 }
 0x171   :  { %v693_v58 = vadd.f32 %v1146_v55, %v692_v57 }
 0x173   :  { %v696_v60 = vmax.f32 %v693_v58, 0.0 }
 0x175   :  { %v697_v61 = vpack.c.bf16 %v696_v60, %v695_v59 }
 0x177   :  { %774 = vmatmul.bf16.vlgmr.msra.gmra.mxu2 %v697_v61 }
 0x1fa   :  { %v775_v62 = vpop.f32.mrf.mxu2 }
 0x1fb   :  { %v776_v1 = vadd.f32 %v1147_v63, %v775_v62 }
 0x202   :  { %v777_v0 = vpop.f32.mrf.mxu2 }
 0x203   :  { %v778_v2 = vadd.f32 %v1147_v63, %v777_v0 }
 0x205   :  { %v1134_v3 = vpack.c.bf16 %v778_v2, %v776_v1 }
 0x207   :  { %1135 = vst [vmem:[#allocation10] sm:$0xff] %v1134_v3  }
 0x208   :  { %787 = vsyncadd [#allocation4], 64  ;;  %s790_s27 = sshll.u32 %s1368_s7, 4  ;;  %s1284_s28 = smov [#allocation10]   ;;  %s791_s27 = int_to_ptr.hbm [resolvable:$true] %s790_s27 }
 0x209   :  { %s788_s29 = sshll.u32 %s1284_s28, 4  ;;  %s789_s29 = int_to_ptr.vmem [resolvable:$true] %s788_s29 }
 0x20a   :  { %796 = dma.vmem_to_hbm [thread:$0]  %s789_s29, 64, %s791_s27, [#allocation4], %s1277_s9, %s1277_s9, %s1278_s10  }
 0x20b   :  { %1274 = dma.done.wait [#allocation4], 128  }
 0x20c   :  { %1275 = vsyncadd [#allocation4], 4294967168 }
 0x20d   :  { %801 = vsyncpa [#allocation3], 1 }
 0x20e   :  { %802 = vsyncpa [#allocation6], 1 }
 0x20f   :  { %803 = vsyncpa [#allocation9], 1 }
 0x210   :  { %804 = vsyncpa [#allocation4], 1 }

</bundles_post_ra>
